<compile_context>
chip_gen: v7x
topology: tpu7x:2x2x1
jax: 0.10.0
libtpu: 0.0.40
codegen_flags: <defaults>
</compile_context>

<pallas_src>
import jax
import jax.numpy as jnp
from jax.experimental import pallas as pl
from jax.experimental.pallas import tpu as pltpu

IN_F = 28 * 28      # 784
H1 = 100
H2 = 50
OUT_F = 10

# lane-dense (128-multiple) padded feature sizes
H1_P = 128
H2_P = 128
OUT_P = 128


def _round_up(x, m):
    return ((x + m - 1) // m) * m


def _choose_tile_b(b8):
    """Pick the batch tile.

    Small batches: one tile (grid=(1,)). Larger batches: aim for ~4 grid
    steps with the tile clamped to [256, 1024] rows so per-grid-step overhead
    is amortised (mem-bound roofline) and both v7x TensorCores get work.
    """
    if b8 <= 256:
        return b8
    tile = _round_up((b8 + 3) // 4, 8)
    return max(256, min(1024, tile))


def mlp_kernel(x_ref, w1_ref, b1_ref, w2_ref, b2_ref, w3_ref, b3_ref, o_ref):
    # x tile arrives f32 straight from HBM; cast to bf16 on the VPU (free —
    # the kernel is HBM-bandwidth-bound) right before the MXU matmul.
    x = x_ref[...].astype(jnp.bfloat16)
    h1 = jnp.dot(x, w1_ref[...], preferred_element_type=jnp.float32) + b1_ref[...]
    h1 = jnp.maximum(h1, 0.0)
    h2 = (jnp.dot(h1.astype(jnp.bfloat16), w2_ref[...],
                  preferred_element_type=jnp.float32) + b2_ref[...])
    h2 = jnp.maximum(h2, 0.0)
    o_ref[...] = (jnp.dot(h2.astype(jnp.bfloat16), w3_ref[...],
                          preferred_element_type=jnp.float32) + b3_ref[...])


def prepare_params(params):
    """One-time prep: zero-pad feature dims to 128 lanes, cast weights to bf16.

    Padded h1/h2 columns are ReLU(0 + 0) = 0 and the corresponding padded
    w2/w3 rows are zero, so padded math == unpadded math.
    """
    w1 = jnp.pad(params["w1"], ((0, 0), (0, H1_P - H1))).astype(jnp.bfloat16)          # (784, 128)
    w2 = jnp.pad(params["w2"], ((0, H1_P - H1), (0, H2_P - H2))).astype(jnp.bfloat16)  # (128, 128)
    w3 = jnp.pad(params["w3"], ((0, H2_P - H2), (0, OUT_P - OUT_F))).astype(jnp.bfloat16)  # (128, 128)
    b1 = jnp.pad(params["b1"], (0, H1_P - H1)).reshape(1, H1_P).astype(jnp.float32)
    b2 = jnp.pad(params["b2"], (0, H2_P - H2)).reshape(1, H2_P).astype(jnp.float32)
    b3 = jnp.pad(params["b3"], (0, OUT_P - OUT_F)).reshape(1, OUT_P).astype(jnp.float32)
    return {"w1": w1, "b1": b1, "w2": w2, "b2": b2, "w3": w3, "b3": b3}


@jax.jit
def my_neural_net_forward(x, padded_params):
    """Pallas equivalent of MyNeuralNet.forward.

    x: (B, 1, 28, 28) float32 (NCHW, like PyTorch).
    padded_params: output of prepare_params().
    """
    pp = padded_params
    x2d = x.reshape(-1, IN_F)          # same as torch .view(-1, 784); f32, free reshape
    b = x2d.shape[0]

    b8 = _round_up(b, 8)
    tile_b = _choose_tile_b(b8)
    b_pad = _round_up(b8, tile_b)
    if b_pad != b:
        x2d = jnp.pad(x2d, ((0, b_pad - b), (0, 0)))
    grid = (b_pad // tile_b,)

    flops = 2 * b_pad * (IN_F * H1_P + H1_P * H2_P + H2_P * OUT_P)
    bytes_accessed = (
        b_pad * IN_F * 4                                        # f32 x in
        + (pp["w1"].size + pp["w2"].size + pp["w3"].size) * 2   # bf16 weights
        + (pp["b1"].size + pp["b2"].size + pp["b3"].size) * 4   # f32 biases
        + b_pad * OUT_P * 4                                     # f32 out
    )

    out = pl.pallas_call(
        mlp_kernel,
        out_shape=jax.ShapeDtypeStruct((b_pad, OUT_P), jnp.float32),
        grid_spec=pltpu.PrefetchScalarGridSpec(
            num_scalar_prefetch=0,
            grid=grid,
            in_specs=[
                pl.BlockSpec((tile_b, IN_F), lambda i: (i, 0)),   # x: tiled over batch, f32
                pl.BlockSpec((IN_F, H1_P), lambda i: (0, 0)),     # w1: VMEM-resident
                pl.BlockSpec((1, H1_P), lambda i: (0, 0)),        # b1
                pl.BlockSpec((H1_P, H2_P), lambda i: (0, 0)),     # w2
                pl.BlockSpec((1, H2_P), lambda i: (0, 0)),        # b2
                pl.BlockSpec((H2_P, OUT_P), lambda i: (0, 0)),    # w3
                pl.BlockSpec((1, OUT_P), lambda i: (0, 0)),       # b3
            ],
            out_specs=pl.BlockSpec((tile_b, OUT_P), lambda i: (i, 0)),
        ),
        compiler_params=pltpu.CompilerParams(
            dimension_semantics=("parallel",),
            vmem_limit_bytes=64 << 20,   # v5e default (16 MiB) is marginal at 1024-row f32 tiles
        ),
        cost_estimate=pl.CostEstimate(
            flops=flops, transcendentals=0, bytes_accessed=bytes_accessed),
    )(x2d, pp["w1"], pp["b1"], pp["w2"], pp["b2"], pp["w3"], pp["b3"])

    out = out[:b, :OUT_F]
    # torch .squeeze(): drops size-1 dims (no-op for B > 1, (10,) for B == 1)
    return jnp.squeeze(out)


def init_params(key):
    """Deterministic init mirroring nn.Linear shapes (stored transposed as (in, out))."""
    ks = jax.random.split(key, 6)

    def linear(kw, kb, fan_in, fan_out):
        bound = 1.0 / jnp.sqrt(fan_in)
        w = jax.random.uniform(kw, (fan_in, fan_out), jnp.float32, -bound, bound)
        b = jax.random.uniform(kb, (fan_out,), jnp.float32, -bound, bound)
        return w, b

    w1, b1 = linear(ks[0], ks[1], IN_F, H1)
    w2, b2 = linear(ks[2], ks[3], H1, H2)
    w3, b3 = linear(ks[4], ks[5], H2, OUT_F)
    return {"w1": w1, "b1": b1, "w2": w2, "b2": b2, "w3": w3, "b3": b3}


def _reference_bf16(x, params):
    """bf16-matched JAX reference (same casts as the kernel, f32 accumulation)."""
    x2d = x.reshape(-1, IN_F).astype(jnp.bfloat16)
    h1 = jnp.maximum(
        jnp.dot(x2d, params["w1"].astype(jnp.bfloat16),
                preferred_element_type=jnp.float32) + params["b1"], 0.0)
    h2 = jnp.maximum(
        jnp.dot(h1.astype(jnp.bfloat16), params["w2"].astype(jnp.bfloat16),
                preferred_element_type=jnp.float32) + params["b2"], 0.0)
    out = (jnp.dot(h2.astype(jnp.bfloat16), params["w3"].astype(jnp.bfloat16),
                   preferred_element_type=jnp.float32) + params["b3"])
    return jnp.squeeze(out)


def _reference_f32(x, params):
    """Pure f32 math (torch-equivalent)."""
    x2d = x.reshape(-1, IN_F)
    h1 = jnp.maximum(x2d @ params["w1"] + params["b1"], 0.0)
    h2 = jnp.maximum(h1 @ params["w2"] + params["b2"], 0.0)
    return jnp.squeeze(h2 @ params["w3"] + params["b3"])


if __name__ == "__main__":
    key = jax.random.PRNGKey(0)
    kx, kp = jax.random.split(key)

    # Small MNIST-like batch: (B, C, H, W) = (8, 1, 28, 28)
    x = jax.random.normal(kx, (8, 1, 28, 28), jnp.float32)
    params = init_params(kp)
    padded_params = prepare_params(params)

    out = my_neural_net_forward(x, padded_params)
    out = jax.block_until_ready(out)
    assert out.shape == (8, 10), out.shape

    ref_bf16 = _reference_bf16(x, params)
    assert jnp.allclose(out, ref_bf16, atol=2e-2, rtol=2e-2), \
        float(jnp.max(jnp.abs(out - ref_bf16)))

    ref_f32 = _reference_f32(x, params)
    assert jnp.allclose(out, ref_f32, atol=6e-2, rtol=6e-2), \
        float(jnp.max(jnp.abs(out - ref_f32)))

    # Extra: batch=1 to check torch-style squeeze semantics -> shape (10,)
    x1 = jax.random.normal(kx, (1, 1, 28, 28), jnp.float32)
    out1 = jax.block_until_ready(my_neural_net_forward(x1, padded_params))
    assert out1.shape == (10,), out1.shape
    assert jnp.allclose(out1, _reference_f32(x1, params), atol=6e-2, rtol=6e-2)

    print("KERNEL_OK")
</pallas_src>

<mosaic_0001>
module attributes {stable_mosaic.version = 11 : i64} {
  func.func @mlp_kernel(%arg0: i32, %arg1: memref<8x784xf32, #tpu.memory_space<vmem>>, %arg2: memref<784x128xbf16, #tpu.memory_space<vmem>>, %arg3: memref<1x128xf32, #tpu.memory_space<vmem>>, %arg4: memref<128x128xbf16, #tpu.memory_space<vmem>>, %arg5: memref<1x128xf32, #tpu.memory_space<vmem>>, %arg6: memref<128x128xbf16, #tpu.memory_space<vmem>>, %arg7: memref<1x128xf32, #tpu.memory_space<vmem>>, %arg8: memref<8x128xf32, #tpu.memory_space<vmem>>) attributes {dimension_semantics = [#tpu.dimension_semantics<parallel>], iteration_bounds = array<i64: 1>, scalar_prefetch = 0 : i64, scratch_operands = 0 : i64, tpu.core_type = #tpu.core_type<tc>, window_params = [{transform_indices = @transform_0, window_bounds = array<i64: 8, 784>}, {pipeline_mode = #tpu.pipeline_mode<synchronous>, transform_indices = @transform_1, window_bounds = array<i64: 784, 128>}, {pipeline_mode = #tpu.pipeline_mode<synchronous>, transform_indices = @transform_2, window_bounds = array<i64: 1, 128>}, {pipeline_mode = #tpu.pipeline_mode<synchronous>, transform_indices = @transform_3, window_bounds = array<i64: 128, 128>}, {pipeline_mode = #tpu.pipeline_mode<synchronous>, transform_indices = @transform_4, window_bounds = array<i64: 1, 128>}, {pipeline_mode = #tpu.pipeline_mode<synchronous>, transform_indices = @transform_5, window_bounds = array<i64: 128, 128>}, {pipeline_mode = #tpu.pipeline_mode<synchronous>, transform_indices = @transform_6, window_bounds = array<i64: 1, 128>}, {transform_indices = @transform_7, window_bounds = array<i64: 8, 128>}]} {
    %c0 = arith.constant 0 : index
    %c0_0 = arith.constant 0 : index
    %0 = vector.load %arg1[%c0, %c0_0] : memref<8x784xf32, #tpu.memory_space<vmem>>, vector<8x784xf32>
    %1 = arith.truncf %0 : vector<8x784xf32> to vector<8x784xbf16>
    %c0_1 = arith.constant 0 : index
    %c0_2 = arith.constant 0 : index
    %2 = vector.load %arg2[%c0_1, %c0_2] : memref<784x128xbf16, #tpu.memory_space<vmem>>, vector<784x128xbf16>
    %cst = arith.constant dense<0.000000e+00> : vector<8x128xf32>
    %3 = tpu.matmul %1, %2, %cst {dimension_numbers = #tpu.dot_dimension_numbers<[1], [0], [0], [1], [0, 0, 1, 1], [], []>} : vector<8x784xbf16>, vector<784x128xbf16>, vector<8x128xf32> -> vector<8x128xf32>
    %c0_3 = arith.constant 0 : index
    %c0_4 = arith.constant 0 : index
    %4 = vector.load %arg3[%c0_3, %c0_4] : memref<1x128xf32, #tpu.memory_space<vmem>>, vector<1x128xf32>
    %5 = vector.broadcast %4 : vector<1x128xf32> to vector<8x128xf32>
    %6 = arith.addf %3, %5 : vector<8x128xf32>
    %cst_5 = arith.constant 0.000000e+00 : f32
    %7 = vector.broadcast %cst_5 : f32 to vector<8x128xf32>
    %8 = arith.maximumf %6, %7 : vector<8x128xf32>
    %9 = arith.truncf %8 : vector<8x128xf32> to vector<8x128xbf16>
    %c0_6 = arith.constant 0 : index
    %c0_7 = arith.constant 0 : index
    %10 = vector.load %arg4[%c0_6, %c0_7] : memref<128x128xbf16, #tpu.memory_space<vmem>>, vector<128x128xbf16>
    %cst_8 = arith.constant dense<0.000000e+00> : vector<8x128xf32>
    %11 = tpu.matmul %9, %10, %cst_8 {dimension_numbers = #tpu.dot_dimension_numbers<[1], [0], [0], [1], [0, 0, 1, 1], [], []>} : vector<8x128xbf16>, vector<128x128xbf16>, vector<8x128xf32> -> vector<8x128xf32>
    %c0_9 = arith.constant 0 : index
    %c0_10 = arith.constant 0 : index
    %12 = vector.load %arg5[%c0_9, %c0_10] : memref<1x128xf32, #tpu.memory_space<vmem>>, vector<1x128xf32>
    %13 = vector.broadcast %12 : vector<1x128xf32> to vector<8x128xf32>
    %14 = arith.addf %11, %13 : vector<8x128xf32>
    %cst_11 = arith.constant 0.000000e+00 : f32
    %15 = vector.broadcast %cst_11 : f32 to vector<8x128xf32>
    %16 = arith.maximumf %14, %15 : vector<8x128xf32>
    %17 = arith.truncf %16 : vector<8x128xf32> to vector<8x128xbf16>
    %c0_12 = arith.constant 0 : index
    %c0_13 = arith.constant 0 : index
    %18 = vector.load %arg6[%c0_12, %c0_13] : memref<128x128xbf16, #tpu.memory_space<vmem>>, vector<128x128xbf16>
    %cst_14 = arith.constant dense<0.000000e+00> : vector<8x128xf32>
    %19 = tpu.matmul %17, %18, %cst_14 {dimension_numbers = #tpu.dot_dimension_numbers<[1], [0], [0], [1], [0, 0, 1, 1], [], []>} : vector<8x128xbf16>, vector<128x128xbf16>, vector<8x128xf32> -> vector<8x128xf32>
    %c0_15 = arith.constant 0 : index
    %c0_16 = arith.constant 0 : index
    %20 = vector.load %arg7[%c0_15, %c0_16] : memref<1x128xf32, #tpu.memory_space<vmem>>, vector<1x128xf32>
    %21 = vector.broadcast %20 : vector<1x128xf32> to vector<8x128xf32>
    %22 = arith.addf %19, %21 : vector<8x128xf32>
    %c0_17 = arith.constant 0 : index
    %c0_18 = arith.constant 0 : index
    %23 = vector.load %arg8[%c0_17, %c0_18] : memref<8x128xf32, #tpu.memory_space<vmem>>, vector<8x128xf32>
    tpu.vector_store %arg8[%c0_17, %c0_18], %22 {strides = array<i32>} : memref<8x128xf32, #tpu.memory_space<vmem>>, vector<8x128xf32>,
    return
  }
  func.func @transform_0(%arg0: i32) -> (i32, i32) {
    %c0_i32 = arith.constant 0 : i32
    %c0_i32_0 = arith.constant 0 : i32
    return %arg0, %c0_i32 : i32, i32
  }
  func.func @transform_1(%arg0: i32) -> (i32, i32) {
    %c0_i32 = arith.constant 0 : i32
    %c0_i32_0 = arith.constant 0 : i32
    %c0_i32_1 = arith.constant 0 : i32
    return %c0_i32, %c0_i32_0 : i32, i32
  }
  func.func @transform_2(%arg0: i32) -> (i32, i32) {
    %c0_i32 = arith.constant 0 : i32
    %c0_i32_0 = arith.constant 0 : i32
    %c0_i32_1 = arith.constant 0 : i32
    return %c0_i32, %c0_i32_0 : i32, i32
  }
  func.func @transform_3(%arg0: i32) -> (i32, i32) {
    %c0_i32 = arith.constant 0 : i32
    %c0_i32_0 = arith.constant 0 : i32
    %c0_i32_1 = arith.constant 0 : i32
    return %c0_i32, %c0_i32_0 : i32, i32
  }
  func.func @transform_4(%arg0: i32) -> (i32, i32) {
    %c0_i32 = arith.constant 0 : i32
    %c0_i32_0 = arith.constant 0 : i32
    %c0_i32_1 = arith.constant 0 : i32
    return %c0_i32, %c0_i32_0 : i32, i32
  }
  func.func @transform_5(%arg0: i32) -> (i32, i32) {
    %c0_i32 = arith.constant 0 : i32
    %c0_i32_0 = arith.constant 0 : i32
    %c0_i32_1 = arith.constant 0 : i32
    return %c0_i32, %c0_i32_0 : i32, i32
  }
  func.func @transform_6(%arg0: i32) -> (i32, i32) {
    %c0_i32 = arith.constant 0 : i32
    %c0_i32_0 = arith.constant 0 : i32
    %c0_i32_1 = arith.constant 0 : i32
    return %c0_i32, %c0_i32_0 : i32, i32
  }
  func.func @transform_7(%arg0: i32) -> (i32, i32) {
    %c0_i32 = arith.constant 0 : i32
    %c0_i32_0 = arith.constant 0 : i32
    return %arg0, %c0_i32 : i32, i32
  }
}

</mosaic_0001>

<bundles_post_ra>
// kernel: my_neural_net_forward.1
= control target key start
LH: loop header
LB: loop body
LE: loop exit
PB: predicated region body
PF: predicated region fallthrough
CT: control target
= control target key end

     0   :  { %12 = vsyncpa [#allocation3], 0  ;;  %s1581_s0 = inlined_call_operand.hbm [shape: f32[8,784], index: 0, kind: input, shape index: {}]   ;;  %s1582_s1 = inlined_call_operand.hbm [shape: bf16[784,128], index: 1, kind: input, shape index: {}]   ;;  %s1583_s2 = inlined_call_operand.hbm [shape: f32[1,128], index: 2, kind: input, shape index: {}]   ;;  %s1584_s3 = inlined_call_operand.hbm [shape: bf16[128,128], index: 3, kind: input, shape index: {}]   ;;  %s1585_s4 = inlined_call_operand.hbm [shape: f32[1,128], index: 4, kind: input, shape index: {}]   ;;  %s1586_s5 = inlined_call_operand.hbm [shape: bf16[128,128], index: 5, kind: input, shape index: {}]   ;;  %s1587_s6 = inlined_call_operand.hbm [shape: f32[1,128], index: 6, kind: input, shape index: {}]   ;;  %s1588_s7 = inlined_call_operand.hbm [shape: f32[8,128], index: 7, kind: output, shape index: {}]  }
   0x1   :  { %13 = vsyncpa [#allocation6], 0 }
   0x2   :  { %14 = vsyncpa [#allocation9], 0 }
   0x3   :  { %15 = vsyncpa [#allocation12], 0 }
   0x4   :  { %16 = vsyncpa [#allocation4], 0  ;;  %s1401_s24 = smov [#allocation5]   ;;  %s1215_s28 = scalar_lea.hbm %s1582_s1, 6272 }
   0x5   :  { %s32_s25 = sshll.u32 %s1401_s24, 4  ;;  %p1216_p0 = scmp.ne.s32.totalorder %s1582_s1, %s1215_s28  ;;  %s33_s25 = int_to_ptr.vmem [resolvable:$true] %s32_s25 }
   0x6   :  { %p1219_p1 = scmp.lt.u32.totalorder %s1215_s28, %s1582_s1 }
   0x8   :  { %p1221_p2 = pnand %p1219_p1, %p1216_p0 }
   0xa   :  { %1224 = shalt.err (!%p1221_p2)
}
   0xb   :  { %s1225_s10 = scalar_lea.vmem %s33_s25, 6272  ;;  %p1230_p4 = scmp.lt.s32.totalorder %s33_s25, %s33_s25 }
   0xc   :  { %p1226_p3 = scmp.ne.s32.totalorder %s33_s25, %s1225_s10  ;;  %p1231_p5 = scmp.lt.s32.totalorder %s1225_s10, %s1225_s10 }
   0xe   :  { %p1232_p6 = por %p1231_p5, %p1230_p4 }
  0x10   :  { %p1233_p7 = pnand %p1232_p6, %p1226_p3 }
  0x12   :  { %1236 = shalt.err (!%p1233_p7)
}
  0x13   :  { %s1402_s11 = smov 64   ;;  %s1403_s12 = smov 4  }
  0x14   :  { %38 = dma.hbm_to_vmem [thread:$0]  %s1582_s1, 6272, %s33_s25, [#allocation6], %s1402_s11, %s1402_s11, %s1403_s12  }
  0x15   :  { %s1404_s15 = smov [#allocation8]   ;;  %s1405_s17 = smov [#allocation11]  }
  0x16   :  { %s54_s16 = sshll.u32 %s1404_s15, 4  ;;  %s76_s18 = sshll.u32 %s1405_s17, 4  ;;  %s55_s16 = int_to_ptr.vmem [resolvable:$true] %s54_s16  ;;  %s77_s18 = int_to_ptr.vmem [resolvable:$true] %s76_s18 }
  0x17   :  { %s1237_s21 = scalar_lea.hbm %s1584_s3, 1024 }
  0x18   :  { %p1238_p8 = scmp.ne.s32.totalorder %s1584_s3, %s1237_s21  ;;  %p1241_p9 = scmp.lt.u32.totalorder %s1237_s21, %s1584_s3 }
  0x1a   :  { %p1243_p10 = pnand %p1241_p9, %p1238_p8 }
  0x1c   :  { %1246 = shalt.err (!%p1243_p10)
}
  0x1d   :  { %s1247_s1 = scalar_lea.vmem %s55_s16, 1024  ;;  %p1252_p12 = scmp.lt.s32.totalorder %s55_s16, %s55_s16 }
  0x1e   :  { %p1248_p11 = scmp.ne.s32.totalorder %s55_s16, %s1247_s1  ;;  %p1253_p13 = scmp.lt.s32.totalorder %s1247_s1, %s1247_s1 }
  0x20   :  { %p1254_p0 = por %p1253_p13, %p1252_p12 }
  0x22   :  { %p1255_p1 = pnand %p1254_p0, %p1248_p11 }
  0x24   :  { %1258 = shalt.err (!%p1255_p1)
}
  0x25   :  { %60 = dma.hbm_to_vmem [thread:$0]  %s1584_s3, 1024, %s55_s16, [#allocation9], %s1402_s11, %s1402_s11, %s1403_s12  }
  0x26   :  { %s1259_s30 = scalar_lea.hbm %s1586_s5, 1024 }
  0x27   :  { %p1260_p2 = scmp.ne.s32.totalorder %s1586_s5, %s1259_s30  ;;  %p1263_p3 = scmp.lt.u32.totalorder %s1259_s30, %s1586_s5 }
  0x29   :  { %p1265_p4 = pnand %p1263_p3, %p1260_p2 }
  0x2b   :  { %1268 = shalt.err (!%p1265_p4)
}
  0x2c   :  { %s1269_s14 = scalar_lea.vmem %s77_s18, 1024  ;;  %p1274_p6 = scmp.lt.s32.totalorder %s77_s18, %s77_s18 }
  0x2d   :  { %p1270_p5 = scmp.ne.s32.totalorder %s77_s18, %s1269_s14  ;;  %p1275_p7 = scmp.lt.s32.totalorder %s1269_s14, %s1269_s14 }
  0x2f   :  { %p1276_p8 = por %p1275_p7, %p1274_p6 }
  0x31   :  { %p1277_p9 = pnand %p1276_p8, %p1270_p5 }
  0x33   :  { %1280 = shalt.err (!%p1277_p9)
}
  0x34   :  { %82 = dma.hbm_to_vmem [thread:$0]  %s1586_s5, 1024, %s77_s18, [#allocation12], %s1402_s11, %s1402_s11, %s1403_s12  }
  0x35   :  { %s1406_s16 = smov [#allocation2]   ;;  %s1407_s19 = smov [#allocation7]  }
  0x36   :  { %s23_s17 = sshll.u32 %s1406_s16, 4  ;;  %s45_s20 = sshll.u32 %s1407_s19, 4  ;;  %s24_s17 = int_to_ptr.vmem [resolvable:$true] %s23_s17  ;;  %s46_s20 = int_to_ptr.vmem [resolvable:$true] %s45_s20 }
  0x37   :  { %s1281_s23 = scalar_lea.hbm %s1581_s0, 896 }
  0x38   :  { %p1282_p10 = scmp.ne.s32.totalorder %s1581_s0, %s1281_s23  ;;  %p1285_p11 = scmp.lt.u32.totalorder %s1281_s23, %s1581_s0 }
  0x3a   :  { %p1287_p12 = pnand %p1285_p11, %p1282_p10 }
  0x3c   :  { %1290 = shalt.err (!%p1287_p12)
}
  0x3d   :  { %s1291_s5 = scalar_lea.vmem %s24_s17, 896  ;;  %p1296_p0 = scmp.lt.s32.totalorder %s24_s17, %s24_s17 }
  0x3e   :  { %p1292_p13 = scmp.ne.s32.totalorder %s24_s17, %s1291_s5  ;;  %p1297_p1 = scmp.lt.s32.totalorder %s1291_s5, %s1291_s5 }
  0x40   :  { %p1298_p2 = por %p1297_p1, %p1296_p0 }
  0x42   :  { %p1299_p3 = pnand %p1298_p2, %p1292_p13 }
  0x44   :  { %1302 = shalt.err (!%p1299_p3)
}
  0x45   :  { %26 = dma.hbm_to_vmem [thread:$0]  %s1581_s0, 896, %s24_s17, [#allocation3]  }
  0x46   :  { %s1303_s28 = scalar_lea.hbm %s1583_s2, 16 }
  0x47   :  { %p1304_p4 = scmp.ne.s32.totalorder %s1583_s2, %s1303_s28  ;;  %p1307_p5 = scmp.lt.u32.totalorder %s1303_s28, %s1583_s2 }
  0x49   :  { %p1309_p6 = pnand %p1307_p5, %p1304_p4 }
  0x4b   :  { %1312 = shalt.err (!%p1309_p6)
}
  0x4c   :  { %s1313_s10 = scalar_lea.vmem %s46_s20, 16  ;;  %s1317_s13 = scalar_lea.vmem %s46_s20, 32 }
  0x4d   :  { %p1314_p7 = scmp.ne.s32.totalorder %s46_s20, %s1313_s10  ;;  %p1318_p8 = scmp.lt.s32.totalorder %s46_s20, %s46_s20 }
  0x4e   :  { %p1319_p9 = scmp.lt.s32.totalorder %s1317_s13, %s1313_s10 }
  0x50   :  { %p1320_p10 = por %p1319_p9, %p1318_p8 }
  0x52   :  { %p1321_p11 = pnand %p1320_p10, %p1314_p7 }
  0x54   :  { %1324 = shalt.err (!%p1321_p11)
}
  0x55   :  { %48 = dma.hbm_to_vmem [thread:$0]  %s1583_s2, 16, %s46_s20, [#allocation6]  }
  0x56   :  { %s1408_s3 = smov [#allocation10]   ;;  %s1409_s16 = smov [#allocation13]  }
  0x57   :  { %s67_s15 = sshll.u32 %s1408_s3, 4  ;;  %s89_s17 = sshll.u32 %s1409_s16, 4  ;;  %s68_s15 = int_to_ptr.vmem [resolvable:$true] %s67_s15  ;;  %s90_s17 = int_to_ptr.vmem [resolvable:$true] %s89_s17 }
  0x58   :  { %s1325_s22 = scalar_lea.hbm %s1585_s4, 16 }
  0x59   :  { %p1326_p12 = scmp.ne.s32.totalorder %s1585_s4, %s1325_s22  ;;  %p1329_p13 = scmp.lt.u32.totalorder %s1325_s22, %s1585_s4 }
  0x5b   :  { %p1331_p0 = pnand %p1329_p13, %p1326_p12 }
  0x5d   :  { %1334 = shalt.err (!%p1331_p0)
}
  0x5e   :  { %s1335_s2 = scalar_lea.vmem %s68_s15, 16  ;;  %s1339_s20 = scalar_lea.vmem %s68_s15, 32 }
  0x5f   :  { %p1336_p1 = scmp.ne.s32.totalorder %s68_s15, %s1335_s2  ;;  %p1340_p2 = scmp.lt.s32.totalorder %s68_s15, %s68_s15 }
  0x60   :  { %p1341_p3 = scmp.lt.s32.totalorder %s1339_s20, %s1335_s2 }
  0x62   :  { %p1342_p4 = por %p1341_p3, %p1340_p2 }
  0x64   :  { %p1343_p5 = pnand %p1342_p4, %p1336_p1 }
  0x66   :  { %1346 = shalt.err (!%p1343_p5)
}
  0x67   :  { %70 = dma.hbm_to_vmem [thread:$0]  %s1585_s4, 16, %s68_s15, [#allocation9]  }
  0x68   :  { %s1347_s18 = scalar_lea.hbm %s1587_s6, 16 }
  0x69   :  { %p1348_p6 = scmp.ne.s32.totalorder %s1587_s6, %s1347_s18  ;;  %p1351_p7 = scmp.lt.u32.totalorder %s1347_s18, %s1587_s6 }
  0x6b   :  { %p1353_p8 = pnand %p1351_p7, %p1348_p6 }
  0x6d   :  { %1356 = shalt.err (!%p1353_p8)
}
  0x6e   :  { %s1357_s8 = scalar_lea.vmem %s90_s17, 16  ;;  %s1361_s9 = scalar_lea.vmem %s90_s17, 32 }
  0x6f   :  { %p1358_p9 = scmp.ne.s32.totalorder %s90_s17, %s1357_s8  ;;  %p1362_p10 = scmp.lt.s32.totalorder %s90_s17, %s90_s17 }
  0x70   :  { %p1363_p11 = scmp.lt.s32.totalorder %s1361_s9, %s1357_s8 }
  0x72   :  { %p1364_p12 = por %p1363_p11, %p1362_p10 }
  0x74   :  { %p1365_p13 = pnand %p1364_p12, %p1358_p9 }
  0x76   :  { %1368 = shalt.err (!%p1365_p13)
}
  0x77   :  { %92 = dma.hbm_to_vmem [thread:$0]  %s1587_s6, 16, %s90_s17, [#allocation12]  }
  0x78   :  { %1391 = dma.done.wait [#allocation3], 896  }
  0x79   :  { %1392 = vsyncadd [#allocation3], 4294966400 }
  0x7a   :  { %1393 = dma.done.wait [#allocation6], 6288  }
  0x7b   :  { %1394 = vsyncadd [#allocation6], 4294961008 }
  0x7c   :  { %1395 = dma.done.wait [#allocation9], 1040  }
  0x7d   :  { %1396 = vsyncadd [#allocation9], 4294966256 }
  0x7e   :  { %1397 = dma.done.wait [#allocation12], 1040  }
  0x7f   :  { %1398 = vsyncadd [#allocation12], 4294966256  ;;  %v1150_v0 = vld [vmem:[#allocation5 + $0x40] sm:$0xff]   ;;  %v1154_v4 = vld [vmem:[#allocation5 + $0x48] sm:$0xff]   ;;  %v1410_v44 = vmov 0.0   ;;  %vm1411_vm0 = vmmov 0  }
  0x80   :  { %v1151_v1 = vld [vmem:[#allocation5] sm:$0xff]   ;;  %1006 = vmatprep.subr.bf16.mxu0 %v1150_v0  ;;  %v1155_v5 = vld [vmem:[#allocation5 + $0x8] sm:$0xff]   ;;  %v1158_v8 = vld [vmem:[#allocation5 + $0x50] sm:$0xff]   ;;  %vm528_vm1 = vcmask 130048   ;;  %s1412_s6 = smov [#allocation14]  }
  0x81   :  { %v1152_v2 = vld [vmem:[#allocation5 + $0xc0] sm:$0xff]   ;;  %1007 = vmatpush3.bf16.msra.mxu0 %v1151_v1  ;;  %v1156_v6 = vld [vmem:[#allocation5 + $0xc8] sm:$0xff]   ;;  %v1159_v9 = vld [vmem:[#allocation5 + $0x10] sm:$0xff]   ;;  %s925_s13 = sshll.u32 %s1412_s6, 4  ;;  %s926_s13 = int_to_ptr.vmem [resolvable:$true] %s925_s13 }
  0x82   :  { %v1153_v3 = vld [vmem:[#allocation5 + $0x80] sm:$0xff]   ;;  %1028 = vmatprep.subr.bf16.mxu1 %v1152_v2  ;;  %1008 = vmatprep.subr.bf16.mxu0 %v1154_v4  ;;  %v1157_v7 = vld [vmem:[#allocation5 + $0x88] sm:$0xff]   ;;  %v1160_v10 = vld [vmem:[#allocation5 + $0xd0] sm:$0xff]   ;;  %s1369_s0 = scalar_lea.vmem %s926_s13, 128  ;;  %p1374_p1 = scmp.lt.s32.totalorder %s926_s13, %s926_s13 }
  0x83   :  { %1029 = vmatpush3.bf16.msra.mxu1 %v1153_v3  ;;  %v1161_v11 = vld [vmem:[#allocation5 + $0x90] sm:$0xff]   ;;  %v1162_v12 = vld [vmem:[#allocation5 + $0x58] sm:$0xff]   ;;  %v1166_v16 = vld [vmem:[#allocation5 + $0x60] sm:$0xff]   ;;  %p1370_p0 = scmp.ne.s32.totalorder %s926_s13, %s1369_s0  ;;  %p1375_p2 = scmp.lt.s32.totalorder %s1369_s0, %s1369_s0 }
  0x84   :  { %1030 = vmatprep.subr.bf16.mxu1 %v1156_v6  ;;  %v1163_v13 = vld [vmem:[#allocation5 + $0x18] sm:$0xff]   ;;  %v1167_v17 = vld [vmem:[#allocation5 + $0x20] sm:$0xff]   ;;  %v1170_v20 = vld [vmem:[#allocation5 + $0x68] sm:$0xff]  }
  0x85   :  { %1009 = vmatpush3.bf16.msra.mxu0 %v1155_v5  ;;  %v1164_v14 = vld [vmem:[#allocation5 + $0xd8] sm:$0xff]   ;;  %v1168_v18 = vld [vmem:[#allocation5 + $0xe0] sm:$0xff]   ;;  %v1171_v21 = vld [vmem:[#allocation5 + $0x28] sm:$0xff]   ;;  %p1376_p3 = por %p1375_p2, %p1374_p1 }
  0x86   :  { %1010 = vmatprep.subr.bf16.mxu0 %v1158_v8  ;;  %v1165_v15 = vld [vmem:[#allocation5 + $0x98] sm:$0xff]   ;;  %v1169_v19 = vld [vmem:[#allocation5 + $0xa0] sm:$0xff]   ;;  %v1172_v22 = vld [vmem:[#allocation5 + $0xe8] sm:$0xff]  }
  0x87   :  { %1031 = vmatpush3.bf16.msra.mxu1 %v1157_v7  ;;  %v1173_v23 = vld [vmem:[#allocation5 + $0xa8] sm:$0xff]   ;;  %v1174_v24 = vld [vmem:[#allocation5 + $0x70] sm:$0xff]   ;;  %v1178_v28 = vld [vmem:[#allocation5 + $0x78] sm:$0xff]   ;;  %p1377_p4 = pnand %p1376_p3, %p1370_p0 }
  0x88   :  { %1032 = vmatprep.subr.bf16.mxu1 %v1160_v10  ;;  %v1175_v25 = vld [vmem:[#allocation5 + $0x30] sm:$0xff]   ;;  %v1179_v29 = vld [vmem:[#allocation5 + $0x38] sm:$0xff]   ;;  %v115_v34 = vld [vmem:[#allocation2] sm:$0xff] }
  0x89   :  { %1011 = vmatpush3.bf16.msra.mxu0 %v1159_v9  ;;  %v1176_v26 = vld [vmem:[#allocation5 + $0xf0] sm:$0xff]   ;;  %v1180_v30 = vld [vmem:[#allocation5 + $0xf8] sm:$0xff]   ;;  %v122_v35 = vpack.c.bf16 %v115_v34, %v115_v34  ;;  %v1182_v36 = vld [vmem:[#allocation5 + $0x140] sm:$0xff]  }
  0x8a   :  { %1012 = vmatprep.subr.bf16.mxu0 %v1162_v12  ;;  %v1177_v27 = vld [vmem:[#allocation5 + $0xb0] sm:$0xff]   ;;  %v1181_v33 = vld [vmem:[#allocation5 + $0xb8] sm:$0xff]   ;;  %v118_v37 = vld [vmem:[#allocation2 + $0x18] sm:$0xff] }
  0x8b   :  { %1033 = vmatpush3.bf16.msra.mxu1 %v1161_v11  ;;  %v116_v31 = vld [vmem:[#allocation2 + $0x8] sm:$0xff]  ;;  %v125_v38 = vpack.c.bf16 %v118_v37, %v118_v37  ;;  %v1183_v39 = vld [vmem:[#allocation5 + $0x100] sm:$0xff]   ;;  %v117_v40 = vld [vmem:[#allocation2 + $0x10] sm:$0xff] }
  0x8c   :  { %1034 = vmatprep.subr.bf16.mxu1 %v1164_v14  ;;  %v123_v32 = vpack.c.bf16 %v116_v31, %v116_v31  ;;  %v124_v41 = vpack.c.bf16 %v117_v40, %v117_v40  ;;  %v1184_v42 = vld [vmem:[#allocation5 + $0x148] sm:$0xff]   ;;  %v1186_v45 = vld [vmem:[#allocation5 + $0x150] sm:$0xff]   ;;  %v1188_v47 = vld [vmem:[#allocation5 + $0x158] sm:$0xff]  }
  0x8d   :  { %1013 = vmatpush3.bf16.msra.mxu0 %v1163_v13  ;;  %604 = vmatprep.mubr.bf16.mxu1 %v125_v38  ;;  %v1185_v43 = vld [vmem:[#allocation5 + $0x108] sm:$0xff]   ;;  %v1187_v46 = vld [vmem:[#allocation5 + $0x110] sm:$0xff]   ;;  %v1189_v48 = vld [vmem:[#allocation5 + $0x118] sm:$0xff]  }
  0x8e   :  { %1014 = vmatprep.subr.bf16.mxu0 %v1166_v16  ;;  %564 = vmatprep.mubr.bf16.mxu0 %v123_v32  ;;  %v1190_v49 = vld [vmem:[#allocation5 + $0x160] sm:$0xff]   ;;  %v1192_v51 = vld [vmem:[#allocation5 + $0x168] sm:$0xff]   ;;  %v120_v54 = vld [vmem:[#allocation2 + $0x28] sm:$0xff] }
  0x8f   :  { %1035 = vmatpush3.bf16.msra.mxu1 %v1165_v15  ;;  %v1191_v50 = vld [vmem:[#allocation5 + $0x120] sm:$0xff]   ;;  %v1193_v52 = vld [vmem:[#allocation5 + $0x128] sm:$0xff]   ;;  %v1194_v55 = vld [vmem:[#allocation5 + $0x170] sm:$0xff]   ;;  %v127_v56 = vpack.c.bf16 %v120_v54, %v120_v54 }
  0x90   :  { %1036 = vmatprep.subr.bf16.mxu1 %v1168_v18  ;;  %v1198_v53 = vld [vmem:[#allocation5 + $0x180] sm:$0xff]   ;;  %v121_v57 = vld [vmem:[#allocation2 + $0x30] sm:$0xff]  ;;  %v1195_v59 = vld [vmem:[#allocation5 + $0x130] sm:$0xff]  }
  0x91   :  { %1015 = vmatpush3.bf16.msra.mxu0 %v1167_v17  ;;  %v128_v58 = vpack.c.bf16 %v121_v57, %v121_v57  ;;  %v1196_v60 = vld [vmem:[#allocation5 + $0x178] sm:$0xff]   ;;  %v119_v62 = vld [vmem:[#allocation2 + $0x20] sm:$0xff] }
  0x92   :  { %1016 = vmatprep.subr.bf16.mxu0 %v1170_v20  ;;  %v1197_v61 = vld [vmem:[#allocation5 + $0x138] sm:$0xff]   ;;  %v126_v63 = vpack.c.bf16 %v119_v62, %v119_v62  ;;  %v1199_v0 = vld [vmem:[#allocation8] sm:$0xff]   ;;  %v1202_v3 = vld [vmem:[#allocation8 + $0x18] sm:$0xff]  }
  0x93   :  { %1037 = vmatpush3.bf16.msra.mxu1 %v1169_v19  ;;  %v1200_v1 = vld [vmem:[#allocation8 + $0x8] sm:$0xff]   ;;  %v1201_v2 = vld [vmem:[#allocation8 + $0x10] sm:$0xff]   ;;  %v1203_v4 = vld [vmem:[#allocation8 + $0x20] sm:$0xff]  }
  0x94   :  { %1038 = vmatprep.subr.bf16.mxu1 %v1172_v22  ;;  %v1204_v5 = vld [vmem:[#allocation8 + $0x28] sm:$0xff]   ;;  %v1205_v6 = vld [vmem:[#allocation8 + $0x30] sm:$0xff]   ;;  %v1206_v7 = vld [vmem:[#allocation8 + $0x38] sm:$0xff]  }
  0x95   :  { %1017 = vmatpush3.bf16.msra.mxu0 %v1171_v21  ;;  %v1207_v8 = vld [vmem:[#allocation11] sm:$0xff]   ;;  %v1208_v9 = vld [vmem:[#allocation11 + $0x8] sm:$0xff]   ;;  %v1209_v10 = vld [vmem:[#allocation11 + $0x10] sm:$0xff]  }
  0x96   :  { %1018 = vmatprep.subr.bf16.mxu0 %v1174_v24  ;;  %v1210_v11 = vld [vmem:[#allocation11 + $0x18] sm:$0xff]   ;;  %v1211_v12 = vld [vmem:[#allocation11 + $0x20] sm:$0xff]   ;;  %v1212_v13 = vld [vmem:[#allocation11 + $0x28] sm:$0xff]  }
  0x97   :  { %1039 = vmatpush3.bf16.msra.mxu1 %v1173_v23  ;;  %v937_v15 = vld [vmem:[#allocation7] ss:$0 sm:$0xff]  ;;  %v1213_v40 = vld [vmem:[#allocation11 + $0x30] sm:$0xff]  }
  0x98   :  { %1040 = vmatprep.subr.bf16.mxu1 %v1176_v26 }
  0x99   :  { %1019 = vmatpush3.bf16.msra.mxu0 %v1175_v25 }
  0x9a   :  { %1020 = vmatprep.subr.bf16.mxu0 %v1178_v28 }
  0x9b   :  { %1041 = vmatpush3.bf16.msra.mxu1 %v1177_v27 }
  0x9c   :  { %1042 = vmatprep.subr.bf16.mxu1 %v1180_v30 }
  0x9d   :  { %1021 = vmatpush3.bf16.msra.mxu0 %v1179_v29 }
  0x9e   :  { %1050 = vmatprep.subr.bf16.mxu0 %v1182_v36 }
  0x9f   :  { %1043 = vmatpush3.bf16.msra.mxu1 %v1181_v33 }
  0xa0   :  { %565 = vmatmul.mubr.bf16.vlgmr.msra.gmra.mrb[0].mxu0 %v122_v35  ;;  %1092 = vmatprep.subr.bf16.mxu1 %v1410_v44 }
  0xa1   :  { %1051 = vmatpush3.bf16.msra.mxu0 %v1183_v39  ;;  %644 = vmatprep.mubr.bf16.mxu0 %v127_v56 }
  0xa2   :  { %605 = vmatmul.mubr.bf16.vlgmr.msra.gmra.mrb[0].mxu1 %v124_v41  ;;  %1052 = vmatprep.subr.bf16.mxu0 %v1184_v42  ;;  %v1214_v41 = vld [vmem:[#allocation11 + $0x38] sm:$0xff]  }
  0xa3   :  { %1094 = vmatprep.mubr.msk.bf16.mxu1 %vm1411_vm0, %v1410_v44  ;;  %1093 = vmatpush3.bf16.msra.mxu1 %v1198_v53  ;;  %v988_v42 = vld [vmem:[#allocation10] ss:$0 sm:$0xff] }
  0xa4   :  { %1098 = vmatprep.subr.bf16.mxu1 %v1410_v44 }
  0xa5   :  { %1053 = vmatpush3.bf16.msra.mxu0 %v1185_v43 }
  0xa6   :  { %1054 = vmatprep.subr.bf16.mxu0 %v1186_v45 }
  0xa9   :  { %1055 = vmatpush3.bf16.msra.mxu0 %v1187_v46 }
  0xaa   :  { %1056 = vmatprep.subr.bf16.mxu0 %v1188_v47  ;;  %1095 = vmatmul.mubr.msk.bf16.vlgmr.msra.gmra.mrb[4].mxu1 %vm528_vm1, %v128_v58 }
  0xab   :  { %1114 = vmatprep.mubr.msk.bf16.mxu1 %vm1411_vm0, %v1410_v44  ;;  %1099 = vmatpush3.bf16.msra.mxu1 %v1199_v0 }
  0xac   :  { %1100 = vmatprep.subr.bf16.mxu1 %v1410_v44 }
  0xad   :  { %1057 = vmatpush3.bf16.msra.mxu0 %v1189_v48 }
  0xae   :  { %1058 = vmatprep.subr.bf16.mxu0 %v1190_v49 }
  0xaf   :  { %1101 = vmatpush3.bf16.msra.mxu1 %v1200_v1 }
  0xb0   :  { %1102 = vmatprep.subr.bf16.mxu1 %v1410_v44 }
  0xb1   :  { %1059 = vmatpush3.bf16.msra.mxu0 %v1191_v50 }
  0xb2   :  { %1060 = vmatprep.subr.bf16.mxu0 %v1192_v51  ;;  %v997_v51 = vld [vmem:[#allocation13] ss:$0 sm:$0xff] }
  0xb3   :  { %1103 = vmatpush3.bf16.msra.mxu1 %v1201_v2 }
  0xb4   :  { %1104 = vmatprep.subr.bf16.mxu1 %v1410_v44 }
  0xb5   :  { %1061 = vmatpush3.bf16.msra.mxu0 %v1193_v52 }
  0xb6   :  { %1062 = vmatprep.subr.bf16.mxu0 %v1194_v55 }
  0xb7   :  { %1105 = vmatpush3.bf16.msra.mxu1 %v1202_v3 }
  0xb8   :  { %1106 = vmatprep.subr.bf16.mxu1 %v1410_v44 }
  0xb9   :  { %1063 = vmatpush3.bf16.msra.mxu0 %v1195_v59 }
  0xba   :  { %1064 = vmatprep.subr.bf16.mxu0 %v1196_v60 }
  0xbb   :  { %1107 = vmatpush3.bf16.msra.mxu1 %v1203_v4 }
  0xbc   :  { %1108 = vmatprep.subr.bf16.mxu1 %v1410_v44 }
  0xbd   :  { %1065 = vmatpush3.bf16.msra.mxu0 %v1197_v61 }
  0xbe   :  { %1118 = vmatprep.subr.bf16.mxu0 %v1410_v44 }
  0xbf   :  { %1109 = vmatpush3.bf16.msra.mxu1 %v1204_v5 }
  0xc0   :  { %645 = vmatmul.mubr.bf16.vlgmr.msra.gmra.mrb[4].mxu0 %v126_v63  ;;  %1110 = vmatprep.subr.bf16.mxu1 %v1410_v44 }
  0xc1   :  { %1134 = vmatprep.mubr.msk.bf16.mxu0 %vm1411_vm0, %v1410_v44  ;;  %1119 = vmatpush3.bf16.msra.mxu0 %v1207_v8 }
  0xc2   :  { %1120 = vmatprep.subr.bf16.mxu0 %v1410_v44 }
  0xc3   :  { %1111 = vmatpush3.bf16.msra.mxu1 %v1205_v6 }
  0xc4   :  { %1112 = vmatprep.subr.bf16.mxu1 %v1410_v44 }
  0xc5   :  { %1121 = vmatpush3.bf16.msra.mxu0 %v1208_v9 }
  0xc6   :  { %1122 = vmatprep.subr.bf16.mxu0 %v1410_v44 }
  0xc7   :  { %1113 = vmatpush3.bf16.msra.mxu1 %v1206_v7 }
  0xc9   :  { %1123 = vmatpush3.bf16.msra.mxu0 %v1209_v10 }
  0xca   :  { %1124 = vmatprep.subr.bf16.mxu0 %v1410_v44 }
  0xcd   :  { %1125 = vmatpush3.bf16.msra.mxu0 %v1210_v11 }
  0xce   :  { %1126 = vmatprep.subr.bf16.mxu0 %v1410_v44 }
  0xd1   :  { %1127 = vmatpush3.bf16.msra.mxu0 %v1211_v12 }
  0xd2   :  { %1128 = vmatprep.subr.bf16.mxu0 %v1410_v44 }
  0xd5   :  { %1129 = vmatpush3.bf16.msra.mxu0 %v1212_v13 }
  0xd6   :  { %1130 = vmatprep.subr.bf16.mxu0 %v1410_v44 }
  0xd9   :  { %1131 = vmatpush3.bf16.msra.mxu0 %v1213_v40 }
  0xda   :  { %1132 = vmatprep.subr.bf16.mxu0 %v1410_v44 }
  0xdd   :  { %1133 = vmatpush3.bf16.msra.mxu0 %v1214_v41 }
 0x173   :  { %v1022_v14 = vpop.f32.mrb[0].mxu0 }
 0x174   :  { %v1023_v16 = vpop.f32.mrb[1].mxu0 }
 0x175   :  { %v1024_v17 = vadd.f32 %v1023_v16, %v1022_v14  ;;  %v1025_v18 = vpop.f32.mrb[2].mxu0  ;;  %v1044_v19 = vpop.f32.mrb[0].mxu1 }
 0x176   :  { %v1026_v20 = vpop.f32.mrb[3].mxu0  ;;  %v1045_v22 = vpop.f32.mrb[1].mxu1 }
 0x177   :  { %v567_v21 = vadd.f32 %v1024_v17, %v937_v15  ;;  %v1046_v23 = vadd.f32 %v1045_v22, %v1044_v19  ;;  %v1047_v24 = vpop.f32.mrb[2].mxu1 }
 0x178   :  { %v1048_v25 = vpop.f32.mrb[3].mxu1 }
 0x179   :  { %v607_v26 = vadd.f32 %v1046_v23, %v567_v21 }
 0x17d   :  { %v686_v27 = vpop.f32.mrb[4].mxu1 }
 0x17e   :  { %v1096_v28 = vpop.f32.mrb[5].mxu1 }
 0x17f   :  { %v689_v29 = vpop.f32.mrb[6].mxu1 }
 0x180   :  { %v1097_v30 = vpop.f32.mrb[7].mxu1 }
 0x193   :  { %v1066_v31 = vpop.f32.mrb[4].mxu0 }
 0x194   :  { %v1067_v32 = vpop.f32.mrb[5].mxu0 }
 0x195   :  { %v1068_v33 = vadd.f32 %v1067_v32, %v1066_v31  ;;  %v1069_v34 = vpop.f32.mrb[6].mxu0 }
 0x196   :  { %v1070_v35 = vpop.f32.mrb[7].mxu0 }
 0x197   :  { %v647_v36 = vadd.f32 %v1068_v33, %v607_v26 }
 0x199   :  { %v687_v37 = vadd.f32 %v686_v27, %v647_v36 }
 0x19b   :  { %v692_v38 = vmax.f32 %v687_v37, 0.0 }
 0x19d   :  { %v693_v39 = vpack.c.bf16 %v692_v38, %v692_v38 }
 0x19f   :  { %1115 = vmatmul.mubr.bf16.vlgmr.msra.gmra.mrb[8].mxu1 %v693_v39 }
 0x272   :  { %v799_v43 = vpop.f32.mrb[8].mxu1 }
 0x273   :  { %v800_v45 = vadd.f32 %v988_v42, %v799_v43  ;;  %v1116_v46 = vpop.f32.mrb[9].mxu1 }
 0x274   :  { %v802_v47 = vpop.f32.mrb[10].mxu1 }
 0x275   :  { %v805_v48 = vmax.f32 %v800_v45, 0.0  ;;  %v1117_v49 = vpop.f32.mrb[11].mxu1 }
 0x277   :  { %v806_v50 = vpack.c.bf16 %v805_v48, %v805_v48 }
 0x279   :  { %1135 = vmatmul.mubr.bf16.vlgmr.msra.gmra.mrb[8].mxu0 %v806_v50 }
 0x34c   :  { %v912_v52 = vpop.f32.mrb[8].mxu0 }
 0x34d   :  { %v913_v53 = vadd.f32 %v997_v51, %v912_v52  ;;  %v1136_v54 = vpop.f32.mrb[9].mxu0 }
 0x34e   :  { %v915_v55 = vpop.f32.mrb[10].mxu0 }
 0x34f   :  { %918 = vst [vmem:[#allocation14] sm:$0xff] %v913_v53  ;;  %v1137_v44 = vpop.f32.mrb[11].mxu0 }
 0x350   :  { %1380 = shalt.err (!%p1377_p4)
}
 0x351   :  { %s1381_s15 = scalar_lea.hbm %s1588_s7, 128 }
 0x352   :  { %p1382_p5 = scmp.ne.s32.totalorder %s1588_s7, %s1381_s15  ;;  %p1385_p6 = scmp.lt.u32.totalorder %s1381_s15, %s1588_s7 }
 0x354   :  { %p1387_p7 = pnand %p1385_p6, %p1382_p5 }
 0x356   :  { %1390 = shalt.err (!%p1387_p7)
}
 0x357   :  { %928 = dma.vmem_to_hbm [thread:$0]  %s926_s13, 128, %s1588_s7, [#allocation4]  }
 0x358   :  { %1399 = dma.done.wait [#allocation4], 128  }
 0x359   :  { %1400 = vsyncadd [#allocation4], 4294967168 }
 0x35a   :  { %932 = vsyncpa [#allocation3], 1 }
 0x35b   :  { %933 = vsyncpa [#allocation6], 1 }
 0x35c   :  { %934 = vsyncpa [#allocation9], 1 }
 0x35d   :  { %935 = vsyncpa [#allocation12], 1 }
 0x35e   :  { %936 = vsyncpa [#allocation4], 1 }

</bundles_post_ra>
